<compile_context>
chip_gen: v6e
topology: v6e:2x2x1
jax: 0.10.0
libtpu: 0.0.40
codegen_flags: <defaults>
</compile_context>

<pallas_src>
import jax
import jax.numpy as jnp
from jax.experimental import pallas as pl
from jax.experimental.pallas import tpu as pltpu


# ----------------------------- Pallas kernel ------------------------------ #
def _patch_proj_kernel(x_ref, w_ref, b_ref, o_ref):
    # x_ref: (tile_n, K) bf16, w_ref: (K, H) bf16, b_ref: (1, H) f32,
    # o_ref: (tile_n, H) f32.  MXU matmul with f32 accumulation, f32 bias add.
    acc = jnp.dot(x_ref[...], w_ref[...], preferred_element_type=jnp.float32)
    o_ref[...] = (acc + b_ref[...]).astype(o_ref.dtype)


def patch_proj(patches, w_mat, bias_row, *, tile_n=256, out_dtype=jnp.float32):
    """patches: (N, K) bf16, w_mat: (K, H) bf16, bias_row: (1, H) f32 -> (N, H) f32."""
    N, K = patches.shape
    H = w_mat.shape[1]

    # Pad N up to a multiple of tile_n (padded rows computed then sliced off).
    n_pad = pl.cdiv(N, tile_n) * tile_n
    if n_pad != N:
        patches = jnp.pad(patches, ((0, n_pad - N), (0, 0)))

    cost = pl.CostEstimate(
        flops=2 * n_pad * K * H,
        transcendentals=0,
        bytes_accessed=(n_pad * K * patches.dtype.itemsize
                        + K * H * w_mat.dtype.itemsize
                        + n_pad * H * jnp.dtype(out_dtype).itemsize),
    )

    out = pl.pallas_call(
        _patch_proj_kernel,
        out_shape=jax.ShapeDtypeStruct((n_pad, H), out_dtype),
        grid_spec=pltpu.PrefetchScalarGridSpec(
            num_scalar_prefetch=0,
            grid=(n_pad // tile_n,),
            in_specs=[
                pl.BlockSpec((tile_n, K), lambda i: (i, 0)),   # patch rows (pipelined)
                pl.BlockSpec((K, H), lambda i: (0, 0)),        # weight, resident
                pl.BlockSpec((1, H), lambda i: (0, 0)),        # bias row, resident
            ],
            out_specs=pl.BlockSpec((tile_n, H), lambda i: (i, 0)),
        ),
        compiler_params=pltpu.CompilerParams(
            dimension_semantics=("parallel",)),
        cost_estimate=cost,
    )(patches, w_mat, bias_row)
    return out[:N]


# ------------------------------ Module port ------------------------------- #
class VJEPA2PatchEmbeddings3DPallas:
    """JAX/Pallas port of VJEPA2PatchEmbeddings3D.

    proj: Conv3d(in_chans -> hidden, kernel=(tubelet, p, p), stride=(tubelet, p, p))
    """

    def __init__(self, in_chans, patch_size, tubelet_size, hidden_size, key,
                 tile_n=256):
        self.in_chans = in_chans
        self.patch_size = patch_size
        self.tubelet_size = tubelet_size
        self.hidden_size = hidden_size
        self.tile_n = tile_n

        k_w, k_b = jax.random.split(key)
        # Conv3d weight layout: (out, in, kT, kH, kW); deterministic init.
        fan_in = in_chans * tubelet_size * patch_size * patch_size
        bound = 1.0 / jnp.sqrt(fan_in)
        self.weight = jax.random.uniform(
            k_w, (hidden_size, in_chans, tubelet_size, patch_size, patch_size),
            dtype=jnp.float32, minval=-bound, maxval=bound)
        self.bias = jax.random.uniform(
            k_b, (hidden_size,), dtype=jnp.float32, minval=-bound, maxval=bound)

        # Hoisted, lane-dense (K, H) weight in bf16 + f32 bias row,
        # flattened in the Conv3d's (c, dt, dh, dw) contraction order.
        K = fan_in
        self.w_mat = self.weight.reshape(hidden_size, K).T.astype(jnp.bfloat16)
        self.b_row = self.bias.reshape(1, hidden_size)

    def __call__(self, pixel_values_videos):
        # pixel_values_videos: (B, C, T, H, W)
        B, C, T, Hs, Ws = pixel_values_videos.shape
        p, tub = self.patch_size, self.tubelet_size
        nT, nH, nW = T // tub, Hs // p, Ws // p
        K = C * tub * p * p

        # --- glue: extract non-overlapping patches, ordered (c, dt, dh, dw) ---
        # Cast to bf16 first so the transpose/reshape moves half the bytes.
        # TODO(synk): fuse patch extraction into the kernel (grid over (b, nT, nH)
        # with a raw-video BlockSpec) to remove this extra HBM round trip.
        x = pixel_values_videos.astype(jnp.bfloat16)
        x = x.reshape(B, C, nT, tub, nH, p, nW, p)
        # -> (B, nT, nH, nW, C, tub, p, p): patch index is t-major, then h, w
        x = jnp.transpose(x, (0, 2, 4, 6, 1, 3, 5, 7))
        patches = x.reshape(B * nT * nH * nW, K)

        # --- hot path: Pallas matmul + bias (bf16 operands, f32 accumulate) ---
        out = patch_proj(patches, self.w_mat, self.b_row, tile_n=self.tile_n,
                         out_dtype=jnp.float32)

        # (B, num_patches, hidden) == conv(x).flatten(2).transpose(1, 2)
        return out.reshape(B, nT * nH * nW, self.hidden_size)


# ------------------------------- reference -------------------------------- #
def _reference(module, x):
    # Plain-JAX f32 Conv3d reference for correctness checking.
    out = jax.lax.conv_general_dilated(
        x, module.weight,
        window_strides=(module.tubelet_size, module.patch_size, module.patch_size),
        padding="VALID",
        dimension_numbers=("NCDHW", "OIDHW", "NCDHW"))
    out = out + module.bias.reshape(1, -1, 1, 1, 1)
    B, H = out.shape[0], out.shape[1]
    return jnp.transpose(out.reshape(B, H, -1), (0, 2, 1))


if __name__ == "__main__":
    key = jax.random.PRNGKey(0)
    k_param, k_in = jax.random.split(key)

    # Small config: in_chans=3, patch_size=4, tubelet=2, hidden=32
    # Video: B=2, C=3, T=4, H=W=8  ->  nT=2, nH=nW=2, num_patches=8 per sample.
    module = VJEPA2PatchEmbeddings3DPallas(
        in_chans=3, patch_size=4, tubelet_size=2, hidden_size=32, key=k_param)

    x = jax.random.normal(k_in, (2, 3, 4, 8, 8), dtype=jnp.float32)

    out = module(x)
    out = jax.block_until_ready(out)

    ref = jax.block_until_ready(_reference(module, x))
    assert out.shape == (2, 8, 32), out.shape
    # bf16 operands (f32 accumulator) -> loosened tolerance vs f32 conv reference.
    assert jnp.allclose(out, ref, atol=2e-2, rtol=2e-2), "mismatch vs conv reference"

    print("KERNEL_OK")
</pallas_src>

<mosaic_0001>
module attributes {stable_mosaic.version = 11 : i64} {
  func.func @_patch_proj_kernel(%arg0: i32, %arg1: memref<256x96xbf16, #tpu.memory_space<vmem>>, %arg2: memref<96x32xbf16, #tpu.memory_space<vmem>>, %arg3: memref<1x32xf32, #tpu.memory_space<vmem>>, %arg4: memref<256x32xf32, #tpu.memory_space<vmem>>) attributes {dimension_semantics = [#tpu.dimension_semantics<parallel>], iteration_bounds = array<i64: 1>, scalar_prefetch = 0 : i64, scratch_operands = 0 : i64, tpu.core_type = #tpu.core_type<tc>, window_params = [{transform_indices = @transform_0, window_bounds = array<i64: 256, 96>}, {pipeline_mode = #tpu.pipeline_mode<synchronous>, transform_indices = @transform_1, window_bounds = array<i64: 96, 32>}, {pipeline_mode = #tpu.pipeline_mode<synchronous>, transform_indices = @transform_2, window_bounds = array<i64: 1, 32>}, {transform_indices = @transform_3, window_bounds = array<i64: 256, 32>}]} {
    %c0 = arith.constant 0 : index
    %c0_0 = arith.constant 0 : index
    %0 = vector.load %arg1[%c0, %c0_0] : memref<256x96xbf16, #tpu.memory_space<vmem>>, vector<256x96xbf16>
    %c0_1 = arith.constant 0 : index
    %c0_2 = arith.constant 0 : index
    %1 = vector.load %arg2[%c0_1, %c0_2] : memref<96x32xbf16, #tpu.memory_space<vmem>>, vector<96x32xbf16>
    %cst = arith.constant dense<0.000000e+00> : vector<256x32xf32>
    %2 = tpu.matmul %0, %1, %cst {dimension_numbers = #tpu.dot_dimension_numbers<[1], [0], [0], [1], [0, 0, 1, 1], [], []>} : vector<256x96xbf16>, vector<96x32xbf16>, vector<256x32xf32> -> vector<256x32xf32>
    %c0_3 = arith.constant 0 : index
    %c0_4 = arith.constant 0 : index
    %3 = vector.load %arg3[%c0_3, %c0_4] : memref<1x32xf32, #tpu.memory_space<vmem>>, vector<1x32xf32>
    %4 = vector.broadcast %3 : vector<1x32xf32> to vector<256x32xf32>
    %5 = arith.addf %2, %4 : vector<256x32xf32>
    %c0_5 = arith.constant 0 : index
    %c0_6 = arith.constant 0 : index
    %6 = vector.load %arg4[%c0_5, %c0_6] : memref<256x32xf32, #tpu.memory_space<vmem>>, vector<256x32xf32>
    tpu.vector_store %arg4[%c0_5, %c0_6], %5 {strides = array<i32>} : memref<256x32xf32, #tpu.memory_space<vmem>>, vector<256x32xf32>,
    return
  }
  func.func @transform_0(%arg0: i32) -> (i32, i32) {
    %c0_i32 = arith.constant 0 : i32
    %c0_i32_0 = arith.constant 0 : i32
    return %arg0, %c0_i32 : i32, i32
  }
  func.func @transform_1(%arg0: i32) -> (i32, i32) {
    %c0_i32 = arith.constant 0 : i32
    %c0_i32_0 = arith.constant 0 : i32
    %c0_i32_1 = arith.constant 0 : i32
    return %c0_i32, %c0_i32_0 : i32, i32
  }
  func.func @transform_2(%arg0: i32) -> (i32, i32) {
    %c0_i32 = arith.constant 0 : i32
    %c0_i32_0 = arith.constant 0 : i32
    %c0_i32_1 = arith.constant 0 : i32
    return %c0_i32, %c0_i32_0 : i32, i32
  }
  func.func @transform_3(%arg0: i32) -> (i32, i32) {
    %c0_i32 = arith.constant 0 : i32
    %c0_i32_0 = arith.constant 0 : i32
    return %arg0, %c0_i32 : i32, i32
  }
}

</mosaic_0001>

<bundles_post_ra>
// kernel: tpu_custom_call.1
= control target key start
LH: loop header
LB: loop body
LE: loop exit
PB: predicated region body
PF: predicated region fallthrough
CT: control target
= control target key end

     0   :  { %vm182_vm0 = vcmask 785408   ;;  %vm392_vm1 = vcmask 261120   ;;  %s835_s1 = inlined_call_operand.vmem [shape: bf16[96,32], index: 1, kind: input, shape index: {}]   ;;  %s836_s0 = inlined_call_operand.vmem [shape: bf16[256,96], index: 0, kind: input, shape index: {}]   ;;  %s837_s2 = inlined_call_operand.vmem [shape: f32[1,32], index: 2, kind: input, shape index: {}]   ;;  %s838_s3 = inlined_call_operand.vmem [shape: f32[256,32], index: 3, kind: output, shape index: {}]  }
   0x1   :  { %v546_v0 = vld [vmem:[%s835_s1 + $0x28] sm:$0xff]   ;;  %v547_v1 = vld [vmem:[%s835_s1 + $0x20] sm:$0xff]   ;;  %v548_v2 = vld [vmem:[%s835_s1 + $0x18] sm:$0xff]  }
   0x2   :  { %490 = vmatprep.subr.bf16.mxu0 %v546_v0  ;;  %534 = vmatprep.subr.bf16.mxu1 %v546_v0  ;;  %v552_v3 = vld [vmem:[%s836_s0] sm:$0xff]   ;;  %v549_v5 = vld [vmem:[%s835_s1 + $0x10] sm:$0xff]   ;;  %v550_v6 = vld [vmem:[%s835_s1 + $0x8] sm:$0xff]  }
   0x3   :  { %491 = vmatpush3.bf16.msra.mxu0 %v546_v0  ;;  %540 = vmatpush3.bf16.msra.mxu1 %v546_v0  ;;  %v553_v4 = vld [vmem:[%s836_s0 + $0x40] sm:$0xff]   ;;  %v554_v8 = vld [vmem:[%s836_s0 + $0x8] sm:$0xff]   ;;  %v556_v10 = vld [vmem:[%s836_s0 + $0x10] sm:$0xff]  }
   0x4   :  { %492 = vmatprep.subr.bf16.mxu0 %v547_v1  ;;  %535 = vmatprep.subr.bf16.mxu1 %v547_v1  ;;  %v551_v7 = vld [vmem:[%s835_s1] sm:$0xff]   ;;  %v555_v9 = vld [vmem:[%s836_s0 + $0x48] sm:$0xff]   ;;  %v557_v11 = vld [vmem:[%s836_s0 + $0x50] sm:$0xff]  }
   0x5   :  { %502 = vmatprep.mubr.msk.bf16.mxu0 %vm182_vm0, %v552_v3  ;;  %518 = vmatprep.mubr.msk.bf16.mxu1 %vm182_vm0, %v553_v4  ;;  %v558_v12 = vld [vmem:[%s836_s0 + $0x18] sm:$0xff]   ;;  %v560_v14 = vld [vmem:[%s836_s0 + $0x20] sm:$0xff]   ;;  %v562_v16 = vld [vmem:[%s836_s0 + $0x28] sm:$0xff]  }
   0x6   :  { %v559_v13 = vld [vmem:[%s836_s0 + $0x58] sm:$0xff]   ;;  %v561_v15 = vld [vmem:[%s836_s0 + $0x60] sm:$0xff]   ;;  %v563_v17 = vld [vmem:[%s836_s0 + $0x68] sm:$0xff]  }
   0x7   :  { %493 = vmatpush3.bf16.msra.mxu0 %v547_v1  ;;  %541 = vmatpush3.bf16.msra.mxu1 %v547_v1  ;;  %v564_v18 = vld [vmem:[%s836_s0 + $0x30] sm:$0xff]   ;;  %v566_v20 = vld [vmem:[%s836_s0 + $0x38] sm:$0xff]   ;;  %v673_v22 = vld [vmem:[%s837_s2] ss:$0 sm:$0xff] }
   0x8   :  { %494 = vmatprep.subr.bf16.mxu0 %v548_v2  ;;  %536 = vmatprep.subr.bf16.mxu1 %v548_v2  ;;  %v565_v19 = vld [vmem:[%s836_s0 + $0x70] sm:$0xff]   ;;  %v567_v21 = vld [vmem:[%s836_s0 + $0x78] sm:$0xff]  }
   0xb   :  { %495 = vmatpush3.bf16.msra.mxu0 %v548_v2  ;;  %542 = vmatpush3.bf16.msra.mxu1 %v548_v2 }
   0xc   :  { %496 = vmatprep.subr.bf16.mxu0 %v549_v5  ;;  %537 = vmatprep.subr.bf16.mxu1 %v549_v5 }
   0xf   :  { %497 = vmatpush3.bf16.msra.mxu0 %v549_v5  ;;  %543 = vmatpush3.bf16.msra.mxu1 %v549_v5 }
  0x10   :  { %498 = vmatprep.subr.bf16.mxu0 %v550_v6  ;;  %538 = vmatprep.subr.bf16.mxu1 %v550_v6 }
  0x13   :  { %499 = vmatpush3.bf16.msra.mxu0 %v550_v6  ;;  %544 = vmatpush3.bf16.msra.mxu1 %v550_v6 }
  0x14   :  { %500 = vmatprep.subr.bf16.mxu0 %v551_v7  ;;  %539 = vmatprep.subr.bf16.mxu1 %v551_v7 }
  0x17   :  { %501 = vmatpush3.bf16.msra.mxu0 %v551_v7  ;;  %545 = vmatpush3.bf16.msra.mxu1 %v551_v7 }
  0x1a   :  { %503 = vmatmul.mubr.msk.bf16.vlgmr.msra.gmra.mxu0 %vm182_vm0, %v554_v8  ;;  %519 = vmatmul.mubr.msk.bf16.vlgmr.msra.gmra.mxu1 %vm182_vm0, %v555_v9 }
  0x1b   :  { %506 = vmatprep.mubr.msk.bf16.mxu0 %vm182_vm0, %v556_v10  ;;  %522 = vmatprep.mubr.msk.bf16.mxu1 %vm182_vm0, %v557_v11 }
  0x22   :  { %507 = vmatmul.mubr.msk.bf16.gmra.mxu0 %vm182_vm0, %v558_v12  ;;  %523 = vmatmul.mubr.msk.bf16.gmra.mxu1 %vm182_vm0, %v559_v13 }
  0x23   :  { %510 = vmatprep.mubr.msk.bf16.mxu0 %vm182_vm0, %v560_v14  ;;  %526 = vmatprep.mubr.msk.bf16.mxu1 %vm182_vm0, %v561_v15 }
  0x2a   :  { %511 = vmatmul.mubr.msk.bf16.gmra.mxu0 %vm182_vm0, %v562_v16  ;;  %527 = vmatmul.mubr.msk.bf16.gmra.mxu1 %vm182_vm0, %v563_v17 }
  0x2b   :  { %514 = vmatprep.mubr.msk.bf16.mxu0 %vm182_vm0, %v564_v18  ;;  %530 = vmatprep.mubr.msk.bf16.mxu1 %vm182_vm0, %v565_v19 }
  0x32   :  { %515 = vmatmul.mubr.msk.bf16.gmra.mxu0 %vm182_vm0, %v566_v20  ;;  %531 = vmatmul.mubr.msk.bf16.gmra.mxu1 %vm182_vm0, %v567_v21 }
  0xda   :  { %v504_v23 = vpop.f32.mrf.mxu0  ;;  %v520_v24 = vpop.f32.mrf.mxu1 }
  0xdb   :  { %v274_v25 = vadd.f32 %v504_v23, %v673_v22  ;;  %v338_v26 = vadd.f32 %v520_v24, %v673_v22 }
  0xdc   :  { %v265_v27 = vpop.f32.mrf.mxu0  ;;  %v329_v28 = vpop.f32.mrf.mxu1 }
  0xdd   :  { %395 = vst.msk [vmem:[%s838_s3 + $0x10] sm:$0xff] %vm392_vm1, %v274_v25  ;;  %411 = vst.msk [vmem:[%s838_s3 + $0x90] sm:$0xff] %vm392_vm1, %v338_v26  ;;  %v266_v29 = vadd.f32 %v673_v22, %v265_v27  ;;  %v330_v30 = vadd.f32 %v673_v22, %v329_v28 }
  0xde   :  { %v505_v31 = vpop.f32.mrf.mxu0  ;;  %v521_v32 = vpop.f32.mrf.mxu1 }
  0xdf   :  { %393 = vst.msk [vmem:[%s838_s3] sm:$0xff] %vm392_vm1, %v266_v29  ;;  %409 = vst.msk [vmem:[%s838_s3 + $0x80] sm:$0xff] %vm392_vm1, %v330_v30  ;;  %v277_v33 = vadd.f32 %v505_v31, %v673_v22  ;;  %v341_v34 = vadd.f32 %v521_v32, %v673_v22 }
  0xe0   :  { %v268_v35 = vpop.f32.mrf.mxu0  ;;  %v332_v36 = vpop.f32.mrf.mxu1 }
  0xe1   :  { %396 = vst.msk [vmem:[%s838_s3 + $0x18] sm:$0xff] %vm392_vm1, %v277_v33  ;;  %412 = vst.msk [vmem:[%s838_s3 + $0x98] sm:$0xff] %vm392_vm1, %v341_v34  ;;  %v269_v37 = vadd.f32 %v673_v22, %v268_v35  ;;  %v333_v38 = vadd.f32 %v673_v22, %v332_v36 }
  0xe2   :  { %v508_v39 = vpop.f32.mrf.mxu0  ;;  %v524_v40 = vpop.f32.mrf.mxu1 }
  0xe3   :  { %394 = vst.msk [vmem:[%s838_s3 + $0x8] sm:$0xff] %vm392_vm1, %v269_v37  ;;  %410 = vst.msk [vmem:[%s838_s3 + $0x88] sm:$0xff] %vm392_vm1, %v333_v38  ;;  %v290_v41 = vadd.f32 %v508_v39, %v673_v22  ;;  %v354_v42 = vadd.f32 %v524_v40, %v673_v22 }
  0xe4   :  { %v281_v43 = vpop.f32.mrf.mxu0  ;;  %v345_v44 = vpop.f32.mrf.mxu1 }
  0xe5   :  { %399 = vst.msk [vmem:[%s838_s3 + $0x30] sm:$0xff] %vm392_vm1, %v290_v41  ;;  %415 = vst.msk [vmem:[%s838_s3 + $0xb0] sm:$0xff] %vm392_vm1, %v354_v42  ;;  %v282_v45 = vadd.f32 %v673_v22, %v281_v43  ;;  %v346_v46 = vadd.f32 %v673_v22, %v345_v44 }
  0xe6   :  { %v509_v47 = vpop.f32.mrf.mxu0  ;;  %v525_v48 = vpop.f32.mrf.mxu1 }
  0xe7   :  { %397 = vst.msk [vmem:[%s838_s3 + $0x20] sm:$0xff] %vm392_vm1, %v282_v45  ;;  %413 = vst.msk [vmem:[%s838_s3 + $0xa0] sm:$0xff] %vm392_vm1, %v346_v46  ;;  %v293_v49 = vadd.f32 %v509_v47, %v673_v22  ;;  %v357_v50 = vadd.f32 %v525_v48, %v673_v22 }
  0xe8   :  { %v284_v51 = vpop.f32.mrf.mxu0  ;;  %v348_v52 = vpop.f32.mrf.mxu1 }
  0xe9   :  { %400 = vst.msk [vmem:[%s838_s3 + $0x38] sm:$0xff] %vm392_vm1, %v293_v49  ;;  %416 = vst.msk [vmem:[%s838_s3 + $0xb8] sm:$0xff] %vm392_vm1, %v357_v50  ;;  %v285_v53 = vadd.f32 %v673_v22, %v284_v51  ;;  %v349_v54 = vadd.f32 %v673_v22, %v348_v52 }
  0xea   :  { %v512_v55 = vpop.f32.mrf.mxu0  ;;  %v528_v56 = vpop.f32.mrf.mxu1 }
  0xeb   :  { %398 = vst.msk [vmem:[%s838_s3 + $0x28] sm:$0xff] %vm392_vm1, %v285_v53  ;;  %414 = vst.msk [vmem:[%s838_s3 + $0xa8] sm:$0xff] %vm392_vm1, %v349_v54  ;;  %v306_v57 = vadd.f32 %v512_v55, %v673_v22  ;;  %v370_v58 = vadd.f32 %v528_v56, %v673_v22 }
  0xec   :  { %v297_v59 = vpop.f32.mrf.mxu0  ;;  %v361_v60 = vpop.f32.mrf.mxu1 }
  0xed   :  { %403 = vst.msk [vmem:[%s838_s3 + $0x50] sm:$0xff] %vm392_vm1, %v306_v57  ;;  %419 = vst.msk [vmem:[%s838_s3 + $0xd0] sm:$0xff] %vm392_vm1, %v370_v58  ;;  %v298_v61 = vadd.f32 %v673_v22, %v297_v59  ;;  %v362_v62 = vadd.f32 %v673_v22, %v361_v60 }
  0xee   :  { %v513_v63 = vpop.f32.mrf.mxu0  ;;  %v529_v0 = vpop.f32.mrf.mxu1 }
  0xef   :  { %401 = vst.msk [vmem:[%s838_s3 + $0x40] sm:$0xff] %vm392_vm1, %v298_v61  ;;  %417 = vst.msk [vmem:[%s838_s3 + $0xc0] sm:$0xff] %vm392_vm1, %v362_v62  ;;  %v309_v1 = vadd.f32 %v513_v63, %v673_v22  ;;  %v373_v2 = vadd.f32 %v529_v0, %v673_v22 }
  0xf0   :  { %v300_v3 = vpop.f32.mrf.mxu0  ;;  %v364_v4 = vpop.f32.mrf.mxu1 }
  0xf1   :  { %404 = vst.msk [vmem:[%s838_s3 + $0x58] sm:$0xff] %vm392_vm1, %v309_v1  ;;  %420 = vst.msk [vmem:[%s838_s3 + $0xd8] sm:$0xff] %vm392_vm1, %v373_v2  ;;  %v301_v5 = vadd.f32 %v673_v22, %v300_v3  ;;  %v365_v6 = vadd.f32 %v673_v22, %v364_v4 }
  0xf2   :  { %v516_v7 = vpop.f32.mrf.mxu0  ;;  %v532_v8 = vpop.f32.mrf.mxu1 }
  0xf3   :  { %402 = vst.msk [vmem:[%s838_s3 + $0x48] sm:$0xff] %vm392_vm1, %v301_v5  ;;  %418 = vst.msk [vmem:[%s838_s3 + $0xc8] sm:$0xff] %vm392_vm1, %v365_v6  ;;  %v322_v9 = vadd.f32 %v516_v7, %v673_v22  ;;  %v386_v10 = vadd.f32 %v532_v8, %v673_v22 }
  0xf4   :  { %v313_v11 = vpop.f32.mrf.mxu0  ;;  %v377_v12 = vpop.f32.mrf.mxu1 }
  0xf5   :  { %407 = vst.msk [vmem:[%s838_s3 + $0x70] sm:$0xff] %vm392_vm1, %v322_v9  ;;  %423 = vst.msk [vmem:[%s838_s3 + $0xf0] sm:$0xff] %vm392_vm1, %v386_v10  ;;  %v314_v13 = vadd.f32 %v673_v22, %v313_v11  ;;  %v378_v14 = vadd.f32 %v673_v22, %v377_v12 }
  0xf6   :  { %v517_v15 = vpop.f32.mrf.mxu0  ;;  %v533_v16 = vpop.f32.mrf.mxu1 }
  0xf7   :  { %405 = vst.msk [vmem:[%s838_s3 + $0x60] sm:$0xff] %vm392_vm1, %v314_v13  ;;  %421 = vst.msk [vmem:[%s838_s3 + $0xe0] sm:$0xff] %vm392_vm1, %v378_v14  ;;  %v325_v17 = vadd.f32 %v517_v15, %v673_v22  ;;  %v389_v18 = vadd.f32 %v533_v16, %v673_v22 }
  0xf8   :  { %v316_v19 = vpop.f32.mrf.mxu0  ;;  %v380_v20 = vpop.f32.mrf.mxu1 }
  0xf9   :  { %408 = vst.msk [vmem:[%s838_s3 + $0x78] sm:$0xff] %vm392_vm1, %v325_v17  ;;  %424 = vst.msk [vmem:[%s838_s3 + $0xf8] sm:$0xff] %vm392_vm1, %v389_v18  ;;  %v317_v21 = vadd.f32 %v673_v22, %v316_v19  ;;  %v381_v23 = vadd.f32 %v673_v22, %v380_v20 }
  0xfb   :  { %406 = vst.msk [vmem:[%s838_s3 + $0x68] sm:$0xff] %vm392_vm1, %v317_v21  ;;  %422 = vst.msk [vmem:[%s838_s3 + $0xe8] sm:$0xff] %vm392_vm1, %v381_v23 }

</bundles_post_ra>
